<compile_context>
chip_gen: v6e
topology: v6e:2x2x1
jax: 0.10.0
libtpu: 0.0.40
codegen_flags: <defaults>
</compile_context>

<pallas_src>
import jax
import jax.numpy as jnp
from jax.experimental import pallas as pl
from jax.experimental.pallas import tpu as pltpu

LANE = 128
NEG_FILL = -1e30  # large-negative bias for padded action columns (avoids inf-inf NaN)


def _round_up(n, m):
    return ((n + m - 1) // m) * m


def policy_fc_kernel(x_ref, w1_ref, b1_ref, w2_ref, b2_ref, probs_ref):
    # fc1 + ReLU: bf16 operands, f32 accumulation on the MXU.
    h = jnp.dot(x_ref[...], w1_ref[...], preferred_element_type=jnp.float32)
    h = jnp.maximum(h + b1_ref[...], 0.0)

    # fc2 (logits). Padded action columns carry a -1e30 bias -> exp underflows to 0.
    logits = jnp.dot(h.astype(jnp.bfloat16), w2_ref[...],
                     preferred_element_type=jnp.float32) + b2_ref[...]

    # numerically stable softmax along the lane (action) axis
    m = jnp.max(logits, axis=-1, keepdims=True)
    e = jnp.exp(logits - m)
    denom = jnp.sum(e, axis=-1, keepdims=True)
    probs_ref[...] = e * pl.reciprocal(denom, approx=True)  # EUP reciprocal, ~free


def policy_fc_forward(x, w1, b1, w2, b2, *, batch_tile=128):
    """x: [B, D_in]; w1: [D_in, H]; b1: [1, H]; w2: [H, A]; b2: [1, A].
    Returns softmax probabilities [B, A] in f32 (the Categorical's parameters)."""
    B, D = x.shape
    H = w1.shape[1]
    A = w2.shape[1]

    # MXU / lane-aligned padded sizes (all padding is exact for the math).
    Dp = _round_up(D, LANE)
    Hp = _round_up(H, LANE)
    Ap = _round_up(A, LANE)
    TB = batch_tile
    Bp = _round_up(max(B, 1), TB)

    # bf16 operands for the MXU; biases stay f32 (added post-accumulation).
    xp = jnp.zeros((Bp, Dp), jnp.bfloat16).at[:B, :D].set(x.astype(jnp.bfloat16))
    w1p = jnp.zeros((Dp, Hp), jnp.bfloat16).at[:D, :H].set(w1.astype(jnp.bfloat16))
    b1p = jnp.zeros((1, Hp), jnp.float32).at[:, :H].set(
        b1.reshape(1, H).astype(jnp.float32))
    w2p = jnp.zeros((Hp, Ap), jnp.bfloat16).at[:H, :A].set(w2.astype(jnp.bfloat16))
    b2p = jnp.full((1, Ap), NEG_FILL, jnp.float32).at[:, :A].set(
        b2.reshape(1, A).astype(jnp.float32))

    grid = (Bp // TB,)
    probs_pad = pl.pallas_call(
        policy_fc_kernel,
        out_shape=jax.ShapeDtypeStruct((Bp, Ap), jnp.float32),
        grid=grid,
        in_specs=[
            pl.BlockSpec((TB, Dp), lambda i: (i, 0)),   # batch tile of x
            pl.BlockSpec((Dp, Hp), lambda i: (0, 0)),   # weights resident
            pl.BlockSpec((1, Hp), lambda i: (0, 0)),
            pl.BlockSpec((Hp, Ap), lambda i: (0, 0)),
            pl.BlockSpec((1, Ap), lambda i: (0, 0)),
        ],
        out_specs=pl.BlockSpec((TB, Ap), lambda i: (i, 0)),
        compiler_params=pltpu.CompilerParams(
            dimension_semantics=("parallel",)),          # v7x dual-TC sharding
    )(xp, w1p, b1p, w2p, b2p)

    return probs_pad[:B, :A]


def init_params(key, input_dimension, hidden, action_space):
    """Xavier-normal weights, zero biases (matches PolicyFC.init_weights).
    Weights are stored as [in, out] (transpose of torch.nn.Linear.weight)."""
    k1, k2 = jax.random.split(key)
    std1 = (2.0 / (input_dimension + hidden)) ** 0.5
    std2 = (2.0 / (hidden + action_space)) ** 0.5
    w1 = std1 * jax.random.normal(k1, (input_dimension, hidden), jnp.float32)
    b1 = jnp.zeros((1, hidden), jnp.float32)
    w2 = std2 * jax.random.normal(k2, (hidden, action_space), jnp.float32)
    b2 = jnp.zeros((1, action_space), jnp.float32)
    return w1, b1, w2, b2


if __name__ == "__main__":
    # Small shapes consistent with the module: batch=2, input_dim=16,
    # hidden=32, action_space=8.
    batch, input_dimension, hidden, action_space = 2, 16, 32, 8

    key = jax.random.PRNGKey(0)
    kx, kp = jax.random.split(key)
    x = jax.random.normal(kx, (batch, input_dimension), jnp.float32)
    w1, b1, w2, b2 = init_params(kp, input_dimension, hidden, action_space)

    probs = policy_fc_forward(x, w1, b1, w2, b2)
    probs = jax.block_until_ready(probs)

    # sanity: valid Categorical probs (approx-reciprocal + bf16 => ~1e-3 tolerance)
    assert probs.shape == (batch, action_space)
    assert bool(jnp.all(probs >= 0.0))
    assert bool(jnp.all(jnp.abs(jnp.sum(probs, axis=-1) - 1.0) < 5e-3))

    print("KERNEL_OK")
</pallas_src>

<mosaic_0001>
module attributes {stable_mosaic.version = 11 : i64} {
  func.func @policy_fc_kernel(%arg0: i32, %arg1: memref<128x128xbf16, #tpu.memory_space<vmem>>, %arg2: memref<128x128xbf16, #tpu.memory_space<vmem>>, %arg3: memref<1x128xf32, #tpu.memory_space<vmem>>, %arg4: memref<128x128xbf16, #tpu.memory_space<vmem>>, %arg5: memref<1x128xf32, #tpu.memory_space<vmem>>, %arg6: memref<128x128xf32, #tpu.memory_space<vmem>>) attributes {dimension_semantics = [#tpu.dimension_semantics<parallel>], iteration_bounds = array<i64: 1>, scalar_prefetch = 0 : i64, scratch_operands = 0 : i64, tpu.core_type = #tpu.core_type<tc>, window_params = [{transform_indices = @transform_0, window_bounds = array<i64: 128, 128>}, {pipeline_mode = #tpu.pipeline_mode<synchronous>, transform_indices = @transform_1, window_bounds = array<i64: 128, 128>}, {pipeline_mode = #tpu.pipeline_mode<synchronous>, transform_indices = @transform_2, window_bounds = array<i64: 1, 128>}, {pipeline_mode = #tpu.pipeline_mode<synchronous>, transform_indices = @transform_3, window_bounds = array<i64: 128, 128>}, {pipeline_mode = #tpu.pipeline_mode<synchronous>, transform_indices = @transform_4, window_bounds = array<i64: 1, 128>}, {transform_indices = @transform_5, window_bounds = array<i64: 128, 128>}]} {
    %c0 = arith.constant 0 : index
    %c0_0 = arith.constant 0 : index
    %0 = vector.load %arg1[%c0, %c0_0] : memref<128x128xbf16, #tpu.memory_space<vmem>>, vector<128x128xbf16>
    %c0_1 = arith.constant 0 : index
    %c0_2 = arith.constant 0 : index
    %1 = vector.load %arg2[%c0_1, %c0_2] : memref<128x128xbf16, #tpu.memory_space<vmem>>, vector<128x128xbf16>
    %cst = arith.constant dense<0.000000e+00> : vector<128x128xf32>
    %2 = tpu.matmul %0, %1, %cst {dimension_numbers = #tpu.dot_dimension_numbers<[1], [0], [0], [1], [0, 0, 1, 1], [], []>} : vector<128x128xbf16>, vector<128x128xbf16>, vector<128x128xf32> -> vector<128x128xf32>
    %c0_3 = arith.constant 0 : index
    %c0_4 = arith.constant 0 : index
    %3 = vector.load %arg3[%c0_3, %c0_4] : memref<1x128xf32, #tpu.memory_space<vmem>>, vector<1x128xf32>
    %4 = vector.broadcast %3 : vector<1x128xf32> to vector<128x128xf32>
    %5 = arith.addf %2, %4 : vector<128x128xf32>
    %cst_5 = arith.constant 0.000000e+00 : f32
    %6 = vector.broadcast %cst_5 : f32 to vector<128x128xf32>
    %7 = arith.maximumf %5, %6 : vector<128x128xf32>
    %8 = arith.truncf %7 : vector<128x128xf32> to vector<128x128xbf16>
    %c0_6 = arith.constant 0 : index
    %c0_7 = arith.constant 0 : index
    %9 = vector.load %arg4[%c0_6, %c0_7] : memref<128x128xbf16, #tpu.memory_space<vmem>>, vector<128x128xbf16>
    %cst_8 = arith.constant dense<0.000000e+00> : vector<128x128xf32>
    %10 = tpu.matmul %8, %9, %cst_8 {dimension_numbers = #tpu.dot_dimension_numbers<[1], [0], [0], [1], [0, 0, 1, 1], [], []>} : vector<128x128xbf16>, vector<128x128xbf16>, vector<128x128xf32> -> vector<128x128xf32>
    %c0_9 = arith.constant 0 : index
    %c0_10 = arith.constant 0 : index
    %11 = vector.load %arg5[%c0_9, %c0_10] : memref<1x128xf32, #tpu.memory_space<vmem>>, vector<1x128xf32>
    %12 = vector.broadcast %11 : vector<1x128xf32> to vector<128x128xf32>
    %13 = arith.addf %10, %12 : vector<128x128xf32>
    %cst_11 = arith.constant dense<0xFF800000> : vector<128xf32>
    %14 = vector.multi_reduction <maximumf>, %13, %cst_11 [1] : vector<128x128xf32> to vector<128xf32>
    %15 = vector.shape_cast %14 : vector<128xf32> to vector<128x1xf32>
    %16 = vector.broadcast %15 : vector<128x1xf32> to vector<128x128xf32>
    %17 = arith.subf %13, %16 : vector<128x128xf32>
    %18 = math.exp %17 : vector<128x128xf32>
    %cst_12 = arith.constant dense<0.000000e+00> : vector<128xf32>
    %19 = vector.multi_reduction <add>, %18, %cst_12 [1] : vector<128x128xf32> to vector<128xf32>
    %20 = vector.shape_cast %19 : vector<128xf32> to vector<128x1xf32>
    %21 = tpu.reciprocal %20 {approx = true} : vector<128x1xf32> -> vector<128x1xf32>
    %22 = vector.broadcast %21 : vector<128x1xf32> to vector<128x128xf32>
    %23 = arith.mulf %18, %22 : vector<128x128xf32>
    %c0_13 = arith.constant 0 : index
    %c0_14 = arith.constant 0 : index
    %24 = vector.load %arg6[%c0_13, %c0_14] : memref<128x128xf32, #tpu.memory_space<vmem>>, vector<128x128xf32>
    tpu.vector_store %arg6[%c0_13, %c0_14], %23 {strides = array<i32>} : memref<128x128xf32, #tpu.memory_space<vmem>>, vector<128x128xf32>,
    return
  }
  func.func @transform_0(%arg0: i32) -> (i32, i32) {
    %c0_i32 = arith.constant 0 : i32
    %c0_i32_0 = arith.constant 0 : i32
    return %arg0, %c0_i32 : i32, i32
  }
  func.func @transform_1(%arg0: i32) -> (i32, i32) {
    %c0_i32 = arith.constant 0 : i32
    %c0_i32_0 = arith.constant 0 : i32
    %c0_i32_1 = arith.constant 0 : i32
    return %c0_i32, %c0_i32_0 : i32, i32
  }
  func.func @transform_2(%arg0: i32) -> (i32, i32) {
    %c0_i32 = arith.constant 0 : i32
    %c0_i32_0 = arith.constant 0 : i32
    %c0_i32_1 = arith.constant 0 : i32
    return %c0_i32, %c0_i32_0 : i32, i32
  }
  func.func @transform_3(%arg0: i32) -> (i32, i32) {
    %c0_i32 = arith.constant 0 : i32
    %c0_i32_0 = arith.constant 0 : i32
    %c0_i32_1 = arith.constant 0 : i32
    return %c0_i32, %c0_i32_0 : i32, i32
  }
  func.func @transform_4(%arg0: i32) -> (i32, i32) {
    %c0_i32 = arith.constant 0 : i32
    %c0_i32_0 = arith.constant 0 : i32
    %c0_i32_1 = arith.constant 0 : i32
    return %c0_i32, %c0_i32_0 : i32, i32
  }
  func.func @transform_5(%arg0: i32) -> (i32, i32) {
    %c0_i32 = arith.constant 0 : i32
    %c0_i32_0 = arith.constant 0 : i32
    return %arg0, %c0_i32 : i32, i32
  }
}

</mosaic_0001>

<bundles_post_ra>
// kernel: tpu_custom_call.1
= control target key start
LH: loop header
LB: loop body
LE: loop exit
PB: predicated region body
PF: predicated region fallthrough
CT: control target
= control target key end

     0   :  { %10 = vsyncpa [#allocation3], 0  ;;  %s1117_s0 = inlined_call_operand.hbm [shape: bf16[128,128], index: 0, kind: input, shape index: {}]   ;;  %s1118_s1 = inlined_call_operand.hbm [shape: bf16[128,128], index: 1, kind: input, shape index: {}]   ;;  %s1119_s2 = inlined_call_operand.vmem [shape: f32[1,128], index: 2, kind: input, shape index: {}]   ;;  %s1120_s3 = inlined_call_operand.hbm [shape: bf16[128,128], index: 3, kind: input, shape index: {}]   ;;  %s1121_s4 = inlined_call_operand.vmem [shape: f32[1,128], index: 4, kind: input, shape index: {}]   ;;  %s1122_s5 = inlined_call_operand.hbm [shape: f32[128,128], index: 5, kind: output, shape index: {}]  }
   0x1   :  { %11 = vsyncpa [#allocation6], 0 }
   0x2   :  { %12 = vsyncpa [#allocation4], 0  ;;  %s969_s18 = smov [#allocation5]   ;;  %s970_s20 = smov [#allocation2]  }
   0x3   :  { %s30_s19 = sshll.u32 %s969_s18, 4  ;;  %s18_s21 = sshll.u32 %s970_s20, 4  ;;  %s31_s19 = int_to_ptr.vmem [resolvable:$true] %s30_s19  ;;  %s19_s21 = int_to_ptr.vmem [resolvable:$true] %s18_s21 }
   0x4   :  { %s891_s22 = scalar_lea.vmem %s31_s19, 1024  ;;  %p896_p1 = scmp.lt.s32.totalorder %s31_s19, %s31_s19 }
   0x5   :  { %p892_p0 = scmp.ne.s32.totalorder %s31_s19, %s891_s22  ;;  %p897_p2 = scmp.lt.s32.totalorder %s891_s22, %s891_s22 }
   0x7   :  { %p898_p3 = por %p897_p2, %p896_p1 }
   0x9   :  { %p899_p4 = pnand %p898_p3, %p892_p0 }
   0xb   :  { %902 = shalt.err (!%p899_p4)
}
   0xc   :  { %s971_s23 = smov 64   ;;  %s972_s24 = smov 4  }
   0xd   :  { %36 = dma.hbm_to_vmem [thread:$0]  %s1118_s1, 1024, %s31_s19, [#allocation6], %s971_s23, %s971_s23, %s972_s24  }
   0xe   :  { %s911_s27 = scalar_lea.vmem %s19_s21, 1024  ;;  %p916_p6 = scmp.lt.s32.totalorder %s19_s21, %s19_s21 }
   0xf   :  { %p912_p5 = scmp.ne.s32.totalorder %s19_s21, %s911_s27  ;;  %p917_p7 = scmp.lt.s32.totalorder %s911_s27, %s911_s27 }
  0x11   :  { %p918_p8 = por %p917_p7, %p916_p6 }
  0x13   :  { %p919_p9 = pnand %p918_p8, %p912_p5 }
  0x15   :  { %922 = shalt.err (!%p919_p9)
}
  0x16   :  { %24 = dma.hbm_to_vmem [thread:$0]  %s1117_s0, 1024, %s19_s21, [#allocation3], %s971_s23, %s971_s23, %s972_s24  }
  0x17   :  { %s973_s30 = smov [#allocation7]  }
  0x18   :  { %s44_s6 = sshll.u32 %s973_s30, 4  ;;  %s45_s6 = int_to_ptr.vmem [resolvable:$true] %s44_s6 }
  0x19   :  { %s931_s7 = scalar_lea.vmem %s45_s6, 1024  ;;  %p936_p11 = scmp.lt.s32.totalorder %s45_s6, %s45_s6 }
  0x1a   :  { %p932_p10 = scmp.ne.s32.totalorder %s45_s6, %s931_s7  ;;  %p937_p12 = scmp.lt.s32.totalorder %s931_s7, %s931_s7 }
  0x1c   :  { %p938_p13 = por %p937_p12, %p936_p11 }
  0x1e   :  { %p939_p0 = pnand %p938_p13, %p932_p10 }
  0x20   :  { %942 = shalt.err (!%p939_p0)
}
  0x21   :  { %50 = dma.hbm_to_vmem [thread:$0]  %s1120_s3, 1024, %s45_s6, [#allocation6], %s971_s23, %s971_s23, %s972_s24  }
  0x22   :  { %963 = dma.done.wait [#allocation3], 1024  }
  0x23   :  { %964 = vsyncadd [#allocation3], 4294966272 }
  0x24   :  { %965 = dma.done.wait [#allocation6], 2048  }
  0x25   :  { %966 = vsyncadd [#allocation6], 4294965248  ;;  %v795_v0 = vld [vmem:[#allocation5 + $0x38] sm:$0xff]   ;;  %v796_v1 = vld [vmem:[#allocation5 + $0x30] sm:$0xff]  }
  0x26   :  { %723 = vmatprep.subr.bf16.mxu0 %v795_v0  ;;  %v797_v2 = vld [vmem:[#allocation5 + $0x28] sm:$0xff]   ;;  %v798_v3 = vld [vmem:[#allocation5 + $0x20] sm:$0xff]   ;;  %v799_v5 = vld [vmem:[#allocation5 + $0x18] sm:$0xff]  }
  0x27   :  { %724 = vmatpush3.bf16.msra.mxu0 %v795_v0  ;;  %v803_v4 = vld [vmem:[#allocation2] sm:$0xff]   ;;  %v800_v6 = vld [vmem:[#allocation5 + $0x10] sm:$0xff]   ;;  %v811_v7 = vld [vmem:[#allocation7 + $0x38] sm:$0xff]  }
  0x28   :  { %725 = vmatprep.subr.bf16.mxu0 %v796_v1  ;;  %739 = vmatprep.mubr.bf16.mxu0 %v803_v4  ;;  %v812_v8 = vld [vmem:[#allocation7 + $0x30] sm:$0xff]   ;;  %v801_v9 = vld [vmem:[#allocation5 + $0x8] sm:$0xff]   ;;  %v802_v11 = vld [vmem:[#allocation5] sm:$0xff]  }
  0x29   :  { %755 = vmatprep.subr.bf16.mxu1 %v811_v7  ;;  %v813_v10 = vld [vmem:[#allocation7 + $0x28] sm:$0xff]   ;;  %v814_v12 = vld [vmem:[#allocation7 + $0x20] sm:$0xff]   ;;  %v815_v13 = vld [vmem:[#allocation7 + $0x18] sm:$0xff]  }
  0x2a   :  { %756 = vmatpush3.bf16.msra.mxu1 %v811_v7  ;;  %v804_v14 = vld [vmem:[#allocation2 + $0x8] sm:$0xff]   ;;  %v805_v15 = vld [vmem:[#allocation2 + $0x10] sm:$0xff]   ;;  %v806_v16 = vld [vmem:[#allocation2 + $0x18] sm:$0xff]  }
  0x2b   :  { %726 = vmatpush3.bf16.msra.mxu0 %v796_v1  ;;  %757 = vmatprep.subr.bf16.mxu1 %v812_v8  ;;  %v807_v17 = vld [vmem:[#allocation2 + $0x20] sm:$0xff]   ;;  %v808_v18 = vld [vmem:[#allocation2 + $0x28] sm:$0xff]   ;;  %v809_v19 = vld [vmem:[#allocation2 + $0x30] sm:$0xff]  }
  0x2c   :  { %727 = vmatprep.subr.bf16.mxu0 %v797_v2  ;;  %v810_v20 = vld [vmem:[#allocation2 + $0x38] sm:$0xff]   ;;  %v816_v21 = vld [vmem:[#allocation7 + $0x10] sm:$0xff]   ;;  %v817_v22 = vld [vmem:[#allocation7 + $0x8] sm:$0xff]  }
  0x2d   :  { %v818_v23 = vld [vmem:[#allocation7] sm:$0xff]  }
  0x2e   :  { %758 = vmatpush3.bf16.msra.mxu1 %v812_v8  ;;  %v665_v26 = vld [vmem:[%s1119_s2] ss:$0 sm:$0xff] }
  0x2f   :  { %728 = vmatpush3.bf16.msra.mxu0 %v797_v2  ;;  %759 = vmatprep.subr.bf16.mxu1 %v813_v10 }
  0x30   :  { %729 = vmatprep.subr.bf16.mxu0 %v798_v3 }
  0x32   :  { %760 = vmatpush3.bf16.msra.mxu1 %v813_v10 }
  0x33   :  { %730 = vmatpush3.bf16.msra.mxu0 %v798_v3  ;;  %761 = vmatprep.subr.bf16.mxu1 %v814_v12 }
  0x34   :  { %731 = vmatprep.subr.bf16.mxu0 %v799_v5 }
  0x36   :  { %762 = vmatpush3.bf16.msra.mxu1 %v814_v12 }
  0x37   :  { %732 = vmatpush3.bf16.msra.mxu0 %v799_v5  ;;  %763 = vmatprep.subr.bf16.mxu1 %v815_v13 }
  0x38   :  { %733 = vmatprep.subr.bf16.mxu0 %v800_v6 }
  0x3a   :  { %764 = vmatpush3.bf16.msra.mxu1 %v815_v13 }
  0x3b   :  { %734 = vmatpush3.bf16.msra.mxu0 %v800_v6  ;;  %765 = vmatprep.subr.bf16.mxu1 %v816_v21 }
  0x3c   :  { %735 = vmatprep.subr.bf16.mxu0 %v801_v9 }
  0x3e   :  { %766 = vmatpush3.bf16.msra.mxu1 %v816_v21 }
  0x3f   :  { %736 = vmatpush3.bf16.msra.mxu0 %v801_v9  ;;  %767 = vmatprep.subr.bf16.mxu1 %v817_v22 }
  0x40   :  { %737 = vmatprep.subr.bf16.mxu0 %v802_v11 }
  0x42   :  { %768 = vmatpush3.bf16.msra.mxu1 %v817_v22 }
  0x43   :  { %738 = vmatpush3.bf16.msra.mxu0 %v802_v11  ;;  %769 = vmatprep.subr.bf16.mxu1 %v818_v23 }
  0x46   :  { %740 = vmatmul.mubr.bf16.vlgmr.msra.gmra.mxu0 %v804_v14  ;;  %770 = vmatpush3.bf16.msra.mxu1 %v818_v23 }
  0x47   :  { %743 = vmatprep.mubr.bf16.mxu0 %v805_v15 }
  0x4e   :  { %744 = vmatmul.mubr.bf16.gmra.mxu0 %v806_v16 }
  0x4f   :  { %747 = vmatprep.mubr.bf16.mxu0 %v807_v17  ;;  %v682_v17 = vld [vmem:[%s1121_s4] ss:$0 sm:$0xff]  ;;  %s974_s4 = smov [#allocation8]  }
  0x50   :  { %s652_s10 = sshll.u32 %s974_s4, 4  ;;  %s653_s10 = int_to_ptr.vmem [resolvable:$true] %s652_s10 }
  0x51   :  { %s943_s11 = scalar_lea.vmem %s653_s10, 2048  ;;  %p948_p2 = scmp.lt.s32.totalorder %s653_s10, %s653_s10 }
  0x52   :  { %p944_p1 = scmp.ne.s32.totalorder %s653_s10, %s943_s11  ;;  %p949_p3 = scmp.lt.s32.totalorder %s943_s11, %s943_s11 }
  0x54   :  { %p950_p4 = por %p949_p3, %p948_p2 }
  0x56   :  { %748 = vmatmul.mubr.bf16.gmra.mxu0 %v808_v18  ;;  %p951_p5 = pnand %p950_p4, %p944_p1 }
  0x57   :  { %751 = vmatprep.mubr.bf16.mxu0 %v809_v19 }
  0x5e   :  { %752 = vmatmul.mubr.bf16.gmra.mxu0 %v810_v20 }
 0x106   :  { %v741_v24 = vpop.f32.mrf.mxu0 }
 0x107   :  { %v241_v30 = vadd.f32 %v741_v24, %v665_v26 }
 0x108   :  { %v232_v25 = vpop.f32.mrf.mxu0 }
 0x109   :  { %v233_v28 = vadd.f32 %v665_v26, %v232_v25  ;;  %v297_v37 = vmax.f32 %v241_v30, 0.0 }
 0x10a   :  { %v742_v27 = vpop.f32.mrf.mxu0 }
 0x10b   :  { %v244_v29 = vadd.f32 %v742_v27, %v665_v26  ;;  %v295_v35 = vmax.f32 %v233_v28, 0.0 }
 0x10c   :  { %v235_v31 = vpop.f32.mrf.mxu0 }
 0x10d   :  { %v236_v32 = vadd.f32 %v665_v26, %v235_v31  ;;  %v298_v33 = vmax.f32 %v244_v29, 0.0 }
 0x10e   :  { %v745_v34 = vpop.f32.mrf.mxu0 }
 0x10f   :  { %v296_v36 = vmax.f32 %v236_v32, 0.0  ;;  %v312_v40 = vpack.c.bf16 %v298_v33, %v297_v37  ;;  %v257_v44 = vadd.f32 %v745_v34, %v665_v26 }
 0x110   :  { %v248_v38 = vpop.f32.mrf.mxu0 }
 0x111   :  { %v311_v39 = vpack.c.bf16 %v296_v36, %v295_v35  ;;  %v249_v42 = vadd.f32 %v665_v26, %v248_v38  ;;  %v301_v51 = vmax.f32 %v257_v44, 0.0 }
 0x112   :  { %v746_v41 = vpop.f32.mrf.mxu0 }
 0x113   :  { %v260_v43 = vadd.f32 %v746_v41, %v665_v26  ;;  %771 = vmatprep.mubr.bf16.mxu1 %v311_v39  ;;  %v299_v49 = vmax.f32 %v249_v42, 0.0 }
 0x114   :  { %v251_v45 = vpop.f32.mrf.mxu0  ;;  %772 = vmatmul.mubr.bf16.vlgmr.msra.gmra.mxu1 %v312_v40 }
 0x115   :  { %v252_v46 = vadd.f32 %v665_v26, %v251_v45  ;;  %v302_v47 = vmax.f32 %v260_v43, 0.0 }
 0x116   :  { %v749_v48 = vpop.f32.mrf.mxu0 }
 0x117   :  { %v300_v50 = vmax.f32 %v252_v46, 0.0  ;;  %v314_v54 = vpack.c.bf16 %v302_v47, %v301_v51  ;;  %v273_v58 = vadd.f32 %v749_v48, %v665_v26 }
 0x118   :  { %v264_v52 = vpop.f32.mrf.mxu0 }
 0x119   :  { %v313_v53 = vpack.c.bf16 %v300_v50, %v299_v49  ;;  %v265_v56 = vadd.f32 %v665_v26, %v264_v52  ;;  %v305_v1 = vmax.f32 %v273_v58, 0.0 }
 0x11a   :  { %v750_v55 = vpop.f32.mrf.mxu0 }
 0x11b   :  { %v276_v57 = vadd.f32 %v750_v55, %v665_v26  ;;  %775 = vmatprep.mubr.bf16.mxu1 %v313_v53  ;;  %v303_v63 = vmax.f32 %v265_v56, 0.0 }
 0x11c   :  { %v267_v59 = vpop.f32.mrf.mxu0  ;;  %776 = vmatmul.mubr.bf16.gmra.mxu1 %v314_v54 }
 0x11d   :  { %v268_v60 = vadd.f32 %v665_v26, %v267_v59  ;;  %v306_v61 = vmax.f32 %v276_v57, 0.0 }
 0x11e   :  { %v753_v62 = vpop.f32.mrf.mxu0 }
 0x11f   :  { %v304_v0 = vmax.f32 %v268_v60, 0.0  ;;  %v316_v4 = vpack.c.bf16 %v306_v61, %v305_v1  ;;  %v289_v8 = vadd.f32 %v753_v62, %v665_v26 }
 0x120   :  { %v280_v2 = vpop.f32.mrf.mxu0 }
 0x121   :  { %v315_v3 = vpack.c.bf16 %v304_v0, %v303_v63  ;;  %v281_v6 = vadd.f32 %v665_v26, %v280_v2  ;;  %v309_v14 = vmax.f32 %v289_v8, 0.0 }
 0x122   :  { %v754_v5 = vpop.f32.mrf.mxu0 }
 0x123   :  { %v292_v7 = vadd.f32 %v754_v5, %v665_v26  ;;  %779 = vmatprep.mubr.bf16.mxu1 %v315_v3  ;;  %v307_v12 = vmax.f32 %v281_v6, 0.0 }
 0x124   :  { %v283_v9 = vpop.f32.mrf.mxu0  ;;  %780 = vmatmul.mubr.bf16.gmra.mxu1 %v316_v4 }
 0x125   :  { %v284_v10 = vadd.f32 %v665_v26, %v283_v9  ;;  %v310_v11 = vmax.f32 %v292_v7, 0.0 }
 0x127   :  { %v308_v13 = vmax.f32 %v284_v10, 0.0  ;;  %v318_v16 = vpack.c.bf16 %v310_v11, %v309_v14 }
 0x129   :  { %v317_v15 = vpack.c.bf16 %v308_v13, %v307_v12 }
 0x12b   :  { %783 = vmatprep.mubr.bf16.mxu1 %v317_v15 }
 0x12c   :  { %784 = vmatmul.mubr.bf16.gmra.mxu1 %v318_v16 }
 0x1d4   :  { %v773_v18 = vpop.f32.mrf.mxu1 }
 0x1d5   :  { %v433_v19 = vadd.f32 %v773_v18, %v682_v17 }
 0x1d6   :  { %v424_v20 = vpop.f32.mrf.mxu1 }
 0x1d7   :  { %v425_v21 = vadd.f32 %v682_v17, %v424_v20  ;;  %491 = vmax.xlane.f32.xlu1 %v433_v19 }
 0x1d8   :  { %v774_v22 = vpop.f32.mrf.mxu1 }
 0x1d9   :  { %v436_v23 = vadd.f32 %v774_v22, %v682_v17  ;;  %487 = vmax.xlane.f32.xlu0 %v425_v21 }
 0x1da   :  { %v427_v24 = vpop.f32.mrf.mxu1 }
 0x1db   :  { %v428_v25 = vadd.f32 %v682_v17, %v427_v24  ;;  %493 = vmax.xlane.f32.xlu1 %v436_v23 }
 0x1dc   :  { %v777_v26 = vpop.f32.mrf.mxu1 }
 0x1dd   :  { %489 = vmax.xlane.f32.xlu0 %v428_v25  ;;  %v449_v28 = vadd.f32 %v777_v26, %v682_v17 }
 0x1de   :  { %v440_v27 = vpop.f32.mrf.mxu1 }
 0x1df   :  { %v441_v32 = vadd.f32 %v682_v17, %v440_v27 }
 0x1e0   :  { %v778_v29 = vpop.f32.mrf.mxu1 }
 0x1e1   :  { %v452_v30 = vadd.f32 %v778_v29, %v682_v17  ;;  %499 = vmax.xlane.f32.xlu0 %v449_v28 }
 0x1e2   :  { %v443_v31 = vpop.f32.mrf.mxu1 }
 0x1e3   :  { %501 = vmax.xlane.f32.xlu1 %v452_v30  ;;  %v444_v34 = vadd.f32 %v682_v17, %v443_v31 }
 0x1e4   :  { %v781_v33 = vpop.f32.mrf.mxu1 }
 0x1e5   :  { %495 = vmax.xlane.f32.xlu0 %v441_v32  ;;  %v465_v36 = vadd.f32 %v781_v33, %v682_v17 }
 0x1e6   :  { %v456_v35 = vpop.f32.mrf.mxu1 }
 0x1e7   :  { %497 = vmax.xlane.f32.xlu1 %v444_v34  ;;  %v1024_v40 = vadd.f32 %v682_v17, %v456_v35 }
 0x1e8   :  { %v782_v37 = vpop.f32.mrf.mxu1 }
 0x1e9   :  { %v1022_v38 = vadd.f32 %v782_v37, %v682_v17  ;;  %507 = vmax.xlane.f32.xlu0 %v465_v36 }
 0x1ea   :  { %v459_v39 = vpop.f32.mrf.mxu1 }
 0x1eb   :  { %509 = vmax.xlane.f32.xlu1 %v1022_v38  ;;  %v1027_v42 = vadd.f32 %v682_v17, %v459_v39 }
 0x1ec   :  { %v785_v41 = vpop.f32.mrf.mxu1 }
 0x1ed   :  { %503 = vmax.xlane.f32.xlu0 %v1024_v40  ;;  %v1034_v47 = vadd.f32 %v785_v41, %v682_v17 }
 0x1ee   :  { %v472_v43 = vpop.f32.mrf.mxu1 }
 0x1ef   :  { %v1030_v44 = vadd.f32 %v682_v17, %v472_v43  ;;  %505 = vmax.xlane.f32.xlu1 %v1027_v42 }
 0x1f0   :  { %v786_v45 = vpop.f32.mrf.mxu1 }
 0x1f1   :  { %511 = vmax.xlane.f32.xlu0 %v1030_v44  ;;  %v1040_v49 = vadd.f32 %v786_v45, %v682_v17 }
 0x1f2   :  { %v475_v46 = vpop.f32.mrf.mxu1 }
 0x1f3   :  { %v1036_v48 = vadd.f32 %v682_v17, %v475_v46 }
 0x1f5   :  { %513 = vmax.xlane.f32.xlu1 %v1036_v48  ;;  %515 = vmax.xlane.f32.xlu0 %v1034_v47 }
 0x1f9   :  { %517 = vmax.xlane.f32.xlu1 %v1040_v49 }
 0x260   :  { %v492_v50 = vpop.xlane.xlu1 %491 }
 0x261   :  { %v521_v51 = vsub.f32 %v433_v19, %v492_v50 }
 0x262   :  { %v488_v52 = vpop.xlane.xlu0 %487 }
 0x263   :  { %v539_v53 = vmul.f32 1.442695, %v521_v51  ;;  %v519_v54 = vsub.f32 %v425_v21, %v488_v52 }
 0x264   :  { %v494_v55 = vpop.xlane.xlu1 %493 }
 0x265   :  { %819 = vpow2.f32 %v539_v53  ;;  %v535_v56 = vmul.f32 1.442695, %v519_v54  ;;  %v522_v57 = vsub.f32 %v436_v23, %v494_v55 }
 0x266   :  { %v490_v58 = vpop.xlane.xlu0 %489 }
 0x267   :  { %v541_v59 = vmul.f32 1.442695, %v522_v57  ;;  %v520_v60 = vsub.f32 %v428_v25, %v490_v58  ;;  %821 = vpow2.f32 %v535_v56 }
 0x269   :  { %823 = vpow2.f32 %v541_v59  ;;  %v537_v61 = vmul.f32 1.442695, %v520_v60 }
 0x26a   :  { %v500_v62 = vpop.xlane.xlu0 %499 }
 0x26b   :  { %v525_v63 = vsub.f32 %v449_v28, %v500_v62  ;;  %825 = vpow2.f32 %v537_v61 }
 0x26c   :  { %v502_v0 = vpop.xlane.xlu1 %501 }
 0x26d   :  { %v547_v1 = vmul.f32 1.442695, %v525_v63  ;;  %v526_v2 = vsub.f32 %v452_v30, %v502_v0 }
 0x26e   :  { %v496_v3 = vpop.xlane.xlu0 %495 }
 0x26f   :  { %827 = vpow2.f32 %v547_v1  ;;  %v549_v4 = vmul.f32 1.442695, %v526_v2  ;;  %v523_v5 = vsub.f32 %v441_v32, %v496_v3 }
 0x270   :  { %v498_v6 = vpop.xlane.xlu1 %497 }
 0x271   :  { %829 = vpow2.f32 %v549_v4  ;;  %v543_v7 = vmul.f32 1.442695, %v523_v5  ;;  %v524_v8 = vsub.f32 %v444_v34, %v498_v6 }
 0x272   :  { %v1043_v9 = vpop.eup %819  ;;  %v508_v10 = vpop.xlane.xlu0 %507 }
 0x273   :  { %831 = vpow2.f32 %v543_v7  ;;  %v545_v11 = vmul.f32 1.442695, %v524_v8  ;;  %v529_v12 = vsub.f32 %v465_v36, %v508_v10  ;;  %571 = vadd.xlane.f32.xlu0 %v1043_v9 }
 0x274   :  { %v510_v13 = vpop.xlane.xlu1 %509  ;;  %v1046_v14 = vpop.eup %821 }
 0x275   :  { %833 = vpow2.f32 %v545_v11  ;;  %v555_v15 = vmul.f32 1.442695, %v529_v12  ;;  %v530_v16 = vsub.f32 %v1022_v38, %v510_v13 }
 0x276   :  { %v1049_v17 = vpop.eup %823  ;;  %v504_v18 = vpop.xlane.xlu0 %503 }
 0x277   :  { %835 = vpow2.f32 %v555_v15  ;;  %v557_v19 = vmul.f32 1.442695, %v530_v16  ;;  %v527_v20 = vsub.f32 %v1024_v40, %v504_v18  ;;  %573 = vadd.xlane.f32.xlu1 %v1049_v17  ;;  %567 = vadd.xlane.f32.xlu0 %v1046_v14 }
 0x278   :  { %v506_v21 = vpop.xlane.xlu1 %505  ;;  %v1055_v24 = vpop.eup %825 }
 0x279   :  { %837 = vpow2.f32 %v557_v19  ;;  %v551_v22 = vmul.f32 1.442695, %v527_v20  ;;  %v528_v23 = vsub.f32 %v1027_v42, %v506_v21 }
 0x27a   :  { %v512_v25 = vpop.xlane.xlu0 %511 }
 0x27b   :  { %839 = vpow2.f32 %v551_v22  ;;  %v553_v26 = vmul.f32 1.442695, %v528_v23  ;;  %v531_v27 = vsub.f32 %v1030_v44, %v512_v25  ;;  %569 = vadd.xlane.f32.xlu1 %v1055_v24 }
 0x27c   :  { %v1059_v28 = vpop.eup %827 }
 0x27d   :  { %841 = vpow2.f32 %v553_v26  ;;  %v559_v29 = vmul.f32 1.442695, %v531_v27  ;;  %579 = vadd.xlane.f32.xlu0 %v1059_v28 }
 0x27e   :  { %v1062_v30 = vpop.eup %829  ;;  %v514_v31 = vpop.xlane.xlu1 %513 }
 0x27f   :  { %v516_v32 = vpop.xlane.xlu0 %515  ;;  %843 = vpow2.f32 %v559_v29  ;;  %v532_v33 = vsub.f32 %v1036_v48, %v514_v31  ;;  %581 = vadd.xlane.f32.xlu1 %v1062_v30 }
 0x280   :  { %v533_v34 = vsub.f32 %v1034_v47, %v516_v32  ;;  %v1067_v35 = vpop.eup %831 }
 0x281   :  { %v561_v36 = vmul.f32 1.442695, %v532_v33  ;;  %575 = vadd.xlane.f32.xlu0 %v1067_v35 }
 0x282   :  { %v563_v37 = vmul.f32 1.442695, %v533_v34  ;;  %v1070_v38 = vpop.eup %833  ;;  %v518_v39 = vpop.xlane.xlu1 %517 }
 0x283   :  { %845 = vpow2.f32 %v561_v36  ;;  %v534_v40 = vsub.f32 %v1040_v49, %v518_v39  ;;  %577 = vadd.xlane.f32.xlu1 %v1070_v38 }
 0x284   :  { %v1074_v41 = vpop.eup %835  ;;  %847 = vpow2.f32 %v563_v37 }
 0x285   :  { %v565_v42 = vmul.f32 1.442695, %v534_v40  ;;  %587 = vadd.xlane.f32.xlu0 %v1074_v41 }
 0x286   :  { %v1077_v43 = vpop.eup %837 }
 0x287   :  { %849 = vpow2.f32 %v565_v42  ;;  %589 = vadd.xlane.f32.xlu1 %v1077_v43 }
 0x288   :  { %v1080_v44 = vpop.eup %839 }
 0x289   :  { %583 = vadd.xlane.f32.xlu0 %v1080_v44 }
 0x28a   :  { %v1083_v45 = vpop.eup %841 }
 0x28b   :  { %585 = vadd.xlane.f32.xlu1 %v1083_v45 }
 0x28c   :  { %v1086_v46 = vpop.eup %843 }
 0x28d   :  { %591 = vadd.xlane.f32.xlu0 %v1086_v46 }
 0x290   :  { %v1089_v47 = vpop.eup %845 }
 0x291   :  { %v1091_v48 = vpop.eup %847  ;;  %593 = vadd.xlane.f32.xlu1 %v1089_v47 }
 0x292   :  { %595 = vadd.xlane.f32.xlu0 %v1091_v48 }
 0x294   :  { %v1095_v49 = vpop.eup %849 }
 0x295   :  { %597 = vadd.xlane.f32.xlu1 %v1095_v49 }
 0x2fc   :  { %v572_v50 = vpop.xlane.xlu0 %571 }
 0x2fd   :  { %851 = vrcp.f32 %v572_v50 }
 0x300   :  { %v574_v51 = vpop.xlane.xlu1 %573  ;;  %v568_v52 = vpop.xlane.xlu0 %567 }
 0x301   :  { %853 = vrcp.f32 %v574_v51 }
 0x302   :  { %855 = vrcp.f32 %v568_v52 }
 0x304   :  { %v570_v53 = vpop.xlane.xlu1 %569 }
 0x305   :  { %857 = vrcp.f32 %v570_v53 }
 0x306   :  { %v580_v54 = vpop.xlane.xlu0 %579 }
 0x307   :  { %859 = vrcp.f32 %v580_v54 }
 0x308   :  { %v582_v55 = vpop.xlane.xlu1 %581 }
 0x309   :  { %861 = vrcp.f32 %v582_v55 }
 0x30a   :  { %v852_v56 = vpop.eup %851  ;;  %v576_v57 = vpop.xlane.xlu0 %575 }
 0x30b   :  { %v617_v58 = vmul.f32 %v852_v56, %v1043_v9  ;;  %863 = vrcp.f32 %v576_v57 }
 0x30c   :  { %v578_v59 = vpop.xlane.xlu1 %577 }
 0x30d   :  { %633 = vst [vmem:[#allocation8 + $0x10] sm:$0xff] %v617_v58  ;;  %865 = vrcp.f32 %v578_v59 }
 0x30e   :  { %v854_v60 = vpop.eup %853  ;;  %v588_v61 = vpop.xlane.xlu0 %587 }
 0x30f   :  { %v856_v62 = vpop.eup %855  ;;  %v618_v63 = vmul.f32 %v854_v60, %v1049_v17  ;;  %867 = vrcp.f32 %v588_v61 }
 0x310   :  { %v615_v0 = vmul.f32 %v856_v62, %v1046_v14  ;;  %v590_v1 = vpop.xlane.xlu1 %589 }
 0x311   :  { %634 = vst [vmem:[#allocation8 + $0x18] sm:$0xff] %v618_v63  ;;  %869 = vrcp.f32 %v590_v1 }
 0x312   :  { %v858_v2 = vpop.eup %857  ;;  %631 = vst [vmem:[#allocation8] sm:$0xff] %v615_v0  ;;  %v584_v3 = vpop.xlane.xlu0 %583 }
 0x313   :  { %v616_v4 = vmul.f32 %v858_v2, %v1055_v24  ;;  %871 = vrcp.f32 %v584_v3 }
 0x314   :  { %v860_v5 = vpop.eup %859  ;;  %v586_v6 = vpop.xlane.xlu1 %585 }
 0x315   :  { %632 = vst [vmem:[#allocation8 + $0x8] sm:$0xff] %v616_v4  ;;  %v621_v7 = vmul.f32 %v860_v5, %v1059_v28  ;;  %873 = vrcp.f32 %v586_v6 }
 0x316   :  { %v862_v8 = vpop.eup %861  ;;  %v592_v9 = vpop.xlane.xlu0 %591 }
 0x317   :  { %637 = vst [vmem:[#allocation8 + $0x30] sm:$0xff] %v621_v7  ;;  %v622_v10 = vmul.f32 %v862_v8, %v1062_v30  ;;  %875 = vrcp.f32 %v592_v9 }
 0x318   :  { %v864_v11 = vpop.eup %863 }
 0x319   :  { %638 = vst [vmem:[#allocation8 + $0x38] sm:$0xff] %v622_v10  ;;  %v619_v12 = vmul.f32 %v864_v11, %v1067_v35 }
 0x31a   :  { %v866_v13 = vpop.eup %865  ;;  %v594_v14 = vpop.xlane.xlu1 %593 }
 0x31b   :  { %635 = vst [vmem:[#allocation8 + $0x20] sm:$0xff] %v619_v12  ;;  %v620_v15 = vmul.f32 %v866_v13, %v1070_v38  ;;  %877 = vrcp.f32 %v594_v14  ;;  %v596_v16 = vpop.xlane.xlu0 %595 }
 0x31c   :  { %v868_v17 = vpop.eup %867  ;;  %879 = vrcp.f32 %v596_v16 }
 0x31d   :  { %636 = vst [vmem:[#allocation8 + $0x28] sm:$0xff] %v620_v15  ;;  %v625_v18 = vmul.f32 %v868_v17, %v1074_v41 }
 0x31e   :  { %v870_v19 = vpop.eup %869  ;;  %v598_v20 = vpop.xlane.xlu1 %597 }
 0x31f   :  { %641 = vst [vmem:[#allocation8 + $0x50] sm:$0xff] %v625_v18  ;;  %v626_v21 = vmul.f32 %v870_v19, %v1077_v43  ;;  %881 = vrcp.f32 %v598_v20 }
 0x320   :  { %v872_v22 = vpop.eup %871 }
 0x321   :  { %642 = vst [vmem:[#allocation8 + $0x58] sm:$0xff] %v626_v21  ;;  %v623_v23 = vmul.f32 %v872_v22, %v1080_v44 }
 0x322   :  { %v874_v24 = vpop.eup %873 }
 0x323   :  { %639 = vst [vmem:[#allocation8 + $0x40] sm:$0xff] %v623_v23  ;;  %v624_v25 = vmul.f32 %v874_v24, %v1083_v45 }
 0x324   :  { %v876_v26 = vpop.eup %875 }
 0x325   :  { %640 = vst [vmem:[#allocation8 + $0x48] sm:$0xff] %v624_v25  ;;  %v627_v27 = vmul.f32 %v876_v26, %v1086_v46 }
 0x327   :  { %643 = vst [vmem:[#allocation8 + $0x60] sm:$0xff] %v627_v27 }
 0x328   :  { %v878_v28 = vpop.eup %877 }
 0x329   :  { %v880_v29 = vpop.eup %879  ;;  %v628_v30 = vmul.f32 %v878_v28, %v1089_v47 }
 0x32a   :  { %v629_v31 = vmul.f32 %v880_v29, %v1091_v48 }
 0x32b   :  { %644 = vst [vmem:[#allocation8 + $0x68] sm:$0xff] %v628_v30 }
 0x32c   :  { %v882_v32 = vpop.eup %881  ;;  %645 = vst [vmem:[#allocation8 + $0x70] sm:$0xff] %v629_v31 }
 0x32d   :  { %v630_v33 = vmul.f32 %v882_v32, %v1095_v49 }
 0x32f   :  { %646 = vst [vmem:[#allocation8 + $0x78] sm:$0xff] %v630_v33 }
 0x330   :  { %954 = shalt.err (!%p951_p5)
}
 0x331   :  { %s975_s12 = smov 128   ;;  %s976_s13 = smov 8  }
 0x332   :  { %658 = dma.vmem_to_hbm [thread:$0]  %s653_s10, 2048, %s1122_s5, [#allocation4], %s975_s12, %s975_s12, %s976_s13  }
 0x333   :  { %967 = dma.done.wait [#allocation4], 2048  }
 0x334   :  { %968 = vsyncadd [#allocation4], 4294965248 }
 0x335   :  { %662 = vsyncpa [#allocation3], 1 }
 0x336   :  { %663 = vsyncpa [#allocation6], 1 }
 0x337   :  { %664 = vsyncpa [#allocation4], 1 }

</bundles_post_ra>
